<compile_context>
chip_gen: v5e
topology: v5e:2x2
jax: 0.10.0
libtpu: 0.0.40
codegen_flags: <defaults>
</compile_context>

<pallas_src>
import jax
import jax.numpy as jnp
from jax.experimental import pallas as pl
from jax.experimental.pallas import tpu as pltpu


# ----- CobaLIFParameters defaults (baked in as Python floats) -----
TAU_SYN_EXC_INV = 1.0 / 5.0
TAU_SYN_INH_INV = 1.0 / 5.0
C_M_INV = 1.0 / 0.2
G_L = (1.0 / 20.0) * (1.0 / 0.2)
E_REV_I = -100.0
E_REV_E = 60.0
V_REST = -20.0
V_RESET = -70.0
V_THRESH = -10.0
DT = 0.001
# TODO(synk): the 'super' surrogate gradient (alpha=100) only affects the backward
# pass; the forward is a hard Heaviside (x > 0), which is what is implemented here.

LANE = 128
SUBLANE = 8


def _round_up(x, m):
    return (x + m - 1) // m * m


def prepare_coba_weights(input_weights, recurrent_weights,
                         compute_dtype=jnp.bfloat16):
    """One-time weight preprocessing (hoist OUT of the per-timestep call).

    input_weights: (H, In)   recurrent_weights: (H, H)   (torch layout)
    Returns (w_fused, dims) with w_fused of shape (In_pad + H_pad, 2*H_pad):
      rows [0, In)              -> input weights
      rows [In_pad, In_pad+H)   -> recurrent weights
      cols [0, H_pad)           -> excitatory (relu(+W)) path
      cols [H_pad, 2*H_pad)     -> inhibitory (relu(-W)) path
    Padding is zero, so padded rows/columns contribute nothing to the real lanes.
    """
    H, In = input_weights.shape
    assert recurrent_weights.shape == (H, H)
    H_pad = _round_up(H, LANE)
    In_pad = _round_up(In, LANE)
    K = In_pad + H_pad

    w_in_t = jnp.transpose(input_weights).astype(jnp.float32)       # (In, H)
    w_rec_t = jnp.transpose(recurrent_weights).astype(jnp.float32)  # (H, H)

    w = jnp.zeros((K, 2 * H_pad), jnp.float32)
    w = w.at[:In, :H].set(jnp.maximum(w_in_t, 0.0))
    w = w.at[:In, H_pad:H_pad + H].set(jnp.maximum(-w_in_t, 0.0))
    w = w.at[In_pad:In_pad + H, :H].set(jnp.maximum(w_rec_t, 0.0))
    w = w.at[In_pad:In_pad + H, H_pad:H_pad + H].set(jnp.maximum(-w_rec_t, 0.0))

    dims = (In, In_pad, H, H_pad)
    return w.astype(compute_dtype), dims


def _coba_lif_kernel(xz_ref, v_ref, ge_ref, gi_ref, w_ref, out_ref):
    h = v_ref.shape[-1]  # padded hidden size (multiple of 128)

    # Single fused MXU matmul (bf16 x bf16 -> f32 accumulate).
    #   columns [0, h)  -> excitatory increment, columns [h, 2h) -> inhibitory.
    acc = jnp.dot(xz_ref[...], w_ref[...], preferred_element_type=jnp.float32)

    # injection, then synaptic decay (matching coba_lif_step order)
    g_e = ge_ref[...] + acc[:, :h]
    g_i = gi_ref[...] + acc[:, h:]
    g_e = g_e + (-DT * TAU_SYN_EXC_INV) * g_e
    g_i = g_i + (-DT * TAU_SYN_INH_INV) * g_i

    # membrane update
    v = v_ref[...]
    dv = DT * C_M_INV * (G_L * (V_REST - v)
                         + g_e * (E_REV_E - v)
                         + g_i * (E_REV_I - v))
    v = v + dv

    # spike (hard Heaviside forward) + reset
    z = (v - V_THRESH > 0.0).astype(jnp.float32)
    v = (1.0 - z) * v + z * V_RESET

    # fused lane-dense output: one (4, bm, H_pad) block, one DMA per grid step
    out_ref[0, :, :] = z
    out_ref[1, :, :] = v
    out_ref[2, :, :] = g_e
    out_ref[3, :, :] = g_i


def coba_lif_recurrent_cell(x, state, prepared_weights, *, block_b=None):
    """x: (B, input_size); state: (z, v, g_e, g_i) each (B, hidden);
    prepared_weights: output of prepare_coba_weights().
    Returns (z_new, (z_new, v, g_e, g_i)) — same semantics as the torch module."""
    w_fused, (In, In_pad, H, H_pad) = prepared_weights
    z, v, g_e, g_i = state
    B = x.shape[0]
    cdtype = w_fused.dtype
    K = In_pad + H_pad

    # batch tile: multiple of 8 sublanes, resident weights, grid over batch
    if block_b is None:
        block_b = min(256, _round_up(B, SUBLANE))
    block_b = _round_up(block_b, SUBLANE)
    B_pad = _round_up(B, block_b)

    # fused, padded [x | z] matmul operand (0/1 spikes -> lossless bf16 cast)
    xz = jnp.zeros((B_pad, K), cdtype)
    xz = xz.at[:B, :In].set(x.astype(cdtype))
    xz = xz.at[:B, In_pad:In_pad + H].set(z.astype(cdtype))

    def _pad_state(a):
        out = jnp.zeros((B_pad, H_pad), jnp.float32)
        return out.at[:B, :H].set(a.astype(jnp.float32))

    v_p, ge_p, gi_p = _pad_state(v), _pad_state(g_e), _pad_state(g_i)

    grid = (B_pad // block_b,)
    out = pl.pallas_call(
        _coba_lif_kernel,
        out_shape=jax.ShapeDtypeStruct((4, B_pad, H_pad), jnp.float32),
        grid=grid,
        in_specs=[
            pl.BlockSpec((block_b, K), lambda i: (i, 0)),       # [x | z]
            pl.BlockSpec((block_b, H_pad), lambda i: (i, 0)),   # v
            pl.BlockSpec((block_b, H_pad), lambda i: (i, 0)),   # g_e
            pl.BlockSpec((block_b, H_pad), lambda i: (i, 0)),   # g_i
            pl.BlockSpec((K, 2 * H_pad), lambda i: (0, 0)),     # resident weights
        ],
        out_specs=pl.BlockSpec((4, block_b, H_pad), lambda i: (0, i, 0)),
        compiler_params=pltpu.CompilerParams(
            dimension_semantics=("parallel",),
            vmem_limit_bytes=64 * 1024 * 1024,
        ),
    )(xz, v_p, ge_p, gi_p, w_fused)

    dt = x.dtype
    z_new = out[0, :B, :H].astype(dt)
    v_new = out[1, :B, :H].astype(dt)
    ge_new = out[2, :B, :H].astype(dt)
    gi_new = out[3, :B, :H].astype(dt)
    # NOTE: for multi-timestep rollouts, step this cell inside a single kernel
    # (grid axis over T with state in VMEM scratch) and precompute the input
    # projections for all T in one large matmul — kept single-step here to match
    # the module's forward() API.
    return z_new, (z_new, v_new, ge_new, gi_new)


def make_params(input_size, hidden_size, key):
    k1, k2 = jax.random.split(key)
    input_weights = jax.random.normal(
        k1, (hidden_size, input_size), jnp.float32) / jnp.sqrt(
            jnp.float32(input_size))
    recurrent_weights = jax.random.normal(
        k2, (hidden_size, hidden_size), jnp.float32) / jnp.sqrt(
            jnp.float32(hidden_size))
    return input_weights, recurrent_weights


if __name__ == "__main__":
    B, INPUT_SIZE, HIDDEN_SIZE = 2, 16, 32
    key = jax.random.PRNGKey(0)
    k_x, k_w = jax.random.split(key)

    # binary spike input, like a spiking network would produce
    x = (jax.random.uniform(k_x, (B, INPUT_SIZE)) < 0.5).astype(jnp.float32)
    input_weights, recurrent_weights = make_params(INPUT_SIZE, HIDDEN_SIZE, k_w)

    # hoisted, one-time weight preprocessing (reused across timesteps)
    prepared = prepare_coba_weights(input_weights, recurrent_weights)

    # default state (forward with state=None): all zeros
    zeros = jnp.zeros((B, HIDDEN_SIZE), jnp.float32)
    state0 = (zeros, zeros, zeros, zeros)

    z_out, state1 = coba_lif_recurrent_cell(x, state0, prepared)
    jax.block_until_ready((z_out, state1))

    # ---- reference (same math as torch coba_lif_step), using the same bf16
    # weight quantization as the kernel's matmul operands ----
    def quant(w):
        return w.astype(jnp.bfloat16).astype(jnp.float32)

    w_in_p = quant(jnp.maximum(input_weights, 0.0))
    w_in_n = quant(jnp.maximum(-input_weights, 0.0))
    w_rc_p = quant(jnp.maximum(recurrent_weights, 0.0))
    w_rc_n = quant(jnp.maximum(-recurrent_weights, 0.0))

    g_e_r = zeros + x @ w_in_p.T + zeros @ w_rc_p.T
    g_i_r = zeros + x @ w_in_n.T + zeros @ w_rc_n.T
    g_e_r = g_e_r - DT * TAU_SYN_EXC_INV * g_e_r
    g_i_r = g_i_r - DT * TAU_SYN_INH_INV * g_i_r
    v_r = zeros + DT * C_M_INV * (G_L * (V_REST - zeros)
                                  + g_e_r * (E_REV_E - zeros)
                                  + g_i_r * (E_REV_I - zeros))
    z_r = (v_r - V_THRESH > 0).astype(jnp.float32)
    v_r = (1.0 - z_r) * v_r + z_r * V_RESET

    assert jnp.allclose(z_out, z_r)
    assert jnp.allclose(state1[1], v_r, atol=1e-3)
    assert jnp.allclose(state1[2], g_e_r, atol=1e-4)
    assert jnp.allclose(state1[3], g_i_r, atol=1e-4)

    # loose check against exact f32 weights (only bf16 weight-quantization error)
    g_e_f = x @ jnp.maximum(input_weights, 0.0).T
    g_i_f = x @ jnp.maximum(-input_weights, 0.0).T
    g_e_f = g_e_f - DT * TAU_SYN_EXC_INV * g_e_f
    g_i_f = g_i_f - DT * TAU_SYN_INH_INV * g_i_f
    assert jnp.allclose(state1[2], g_e_f, atol=5e-2)
    assert jnp.allclose(state1[3], g_i_f, atol=5e-2)

    print("KERNEL_OK")
</pallas_src>

<mosaic_0001>
module attributes {stable_mosaic.version = 11 : i64} {
  func.func @_coba_lif_kernel(%arg0: i32, %arg1: memref<8x256xbf16, #tpu.memory_space<vmem>>, %arg2: memref<8x128xf32, #tpu.memory_space<vmem>>, %arg3: memref<8x128xf32, #tpu.memory_space<vmem>>, %arg4: memref<8x128xf32, #tpu.memory_space<vmem>>, %arg5: memref<256x256xbf16, #tpu.memory_space<vmem>>, %arg6: memref<4x8x128xf32, #tpu.memory_space<vmem>>) attributes {dimension_semantics = [#tpu.dimension_semantics<parallel>], iteration_bounds = array<i64: 1>, scalar_prefetch = 0 : i64, scratch_operands = 0 : i64, tpu.core_type = #tpu.core_type<tc>, window_params = [{transform_indices = @transform_0, window_bounds = array<i64: 8, 256>}, {transform_indices = @transform_1, window_bounds = array<i64: 8, 128>}, {transform_indices = @transform_2, window_bounds = array<i64: 8, 128>}, {transform_indices = @transform_3, window_bounds = array<i64: 8, 128>}, {pipeline_mode = #tpu.pipeline_mode<synchronous>, transform_indices = @transform_4, window_bounds = array<i64: 256, 256>}, {transform_indices = @transform_5, window_bounds = array<i64: 4, 8, 128>}]} {
    %c0 = arith.constant 0 : index
    %c0_0 = arith.constant 0 : index
    %0 = vector.load %arg1[%c0, %c0_0] : memref<8x256xbf16, #tpu.memory_space<vmem>>, vector<8x256xbf16>
    %c0_1 = arith.constant 0 : index
    %c0_2 = arith.constant 0 : index
    %1 = vector.load %arg5[%c0_1, %c0_2] : memref<256x256xbf16, #tpu.memory_space<vmem>>, vector<256x256xbf16>
    %cst = arith.constant dense<0.000000e+00> : vector<8x256xf32>
    %2 = tpu.matmul %0, %1, %cst {dimension_numbers = #tpu.dot_dimension_numbers<[1], [0], [0], [1], [0, 0, 1, 1], [], []>} : vector<8x256xbf16>, vector<256x256xbf16>, vector<8x256xf32> -> vector<8x256xf32>
    %c0_3 = arith.constant 0 : index
    %c0_4 = arith.constant 0 : index
    %3 = vector.load %arg3[%c0_3, %c0_4] : memref<8x128xf32, #tpu.memory_space<vmem>>, vector<8x128xf32>
    %4 = vector.extract_strided_slice %2 {offsets = [0, 0], sizes = [8, 128], strides = [1, 1]} : vector<8x256xf32> to vector<8x128xf32>
    %5 = arith.addf %3, %4 : vector<8x128xf32>
    %c0_5 = arith.constant 0 : index
    %c0_6 = arith.constant 0 : index
    %6 = vector.load %arg4[%c0_5, %c0_6] : memref<8x128xf32, #tpu.memory_space<vmem>>, vector<8x128xf32>
    %7 = vector.extract_strided_slice %2 {offsets = [0, 128], sizes = [8, 128], strides = [1, 1]} : vector<8x256xf32> to vector<8x128xf32>
    %8 = arith.addf %6, %7 : vector<8x128xf32>
    %cst_7 = arith.constant -2.000000e-04 : f32
    %9 = vector.broadcast %cst_7 : f32 to vector<8x128xf32>
    %10 = arith.mulf %9, %5 : vector<8x128xf32>
    %11 = arith.addf %5, %10 : vector<8x128xf32>
    %cst_8 = arith.constant -2.000000e-04 : f32
    %12 = vector.broadcast %cst_8 : f32 to vector<8x128xf32>
    %13 = arith.mulf %12, %8 : vector<8x128xf32>
    %14 = arith.addf %8, %13 : vector<8x128xf32>
    %c0_9 = arith.constant 0 : index
    %c0_10 = arith.constant 0 : index
    %15 = vector.load %arg2[%c0_9, %c0_10] : memref<8x128xf32, #tpu.memory_space<vmem>>, vector<8x128xf32>
    %cst_11 = arith.constant -2.000000e+01 : f32
    %16 = vector.broadcast %cst_11 : f32 to vector<8x128xf32>
    %17 = arith.subf %16, %15 : vector<8x128xf32>
    %cst_12 = arith.constant 2.500000e-01 : f32
    %18 = vector.broadcast %cst_12 : f32 to vector<8x128xf32>
    %19 = arith.mulf %18, %17 : vector<8x128xf32>
    %cst_13 = arith.constant 6.000000e+01 : f32
    %20 = vector.broadcast %cst_13 : f32 to vector<8x128xf32>
    %21 = arith.subf %20, %15 : vector<8x128xf32>
    %22 = arith.mulf %11, %21 : vector<8x128xf32>
    %23 = arith.addf %19, %22 : vector<8x128xf32>
    %cst_14 = arith.constant -1.000000e+02 : f32
    %24 = vector.broadcast %cst_14 : f32 to vector<8x128xf32>
    %25 = arith.subf %24, %15 : vector<8x128xf32>
    %26 = arith.mulf %14, %25 : vector<8x128xf32>
    %27 = arith.addf %23, %26 : vector<8x128xf32>
    %cst_15 = arith.constant 5.000000e-03 : f32
    %28 = vector.broadcast %cst_15 : f32 to vector<8x128xf32>
    %29 = arith.mulf %28, %27 : vector<8x128xf32>
    %30 = arith.addf %15, %29 : vector<8x128xf32>
    %cst_16 = arith.constant -1.000000e+01 : f32
    %31 = vector.broadcast %cst_16 : f32 to vector<8x128xf32>
    %32 = arith.subf %30, %31 : vector<8x128xf32>
    %cst_17 = arith.constant 0.000000e+00 : f32
    %33 = vector.broadcast %cst_17 : f32 to vector<8x128xf32>
    %34 = arith.cmpf ogt, %32, %33 : vector<8x128xf32>
    %35 = arith.extui %34 : vector<8x128xi1> to vector<8x128xi32>
    %36 = arith.sitofp %35 : vector<8x128xi32> to vector<8x128xf32>
    %cst_18 = arith.constant 1.000000e+00 : f32
    %37 = vector.broadcast %cst_18 : f32 to vector<8x128xf32>
    %38 = arith.subf %37, %36 : vector<8x128xf32>
    %39 = arith.mulf %38, %30 : vector<8x128xf32>
    %cst_19 = arith.constant -7.000000e+01 : f32
    %40 = vector.broadcast %cst_19 : f32 to vector<8x128xf32>
    %41 = arith.mulf %36, %40 : vector<8x128xf32>
    %42 = arith.addf %39, %41 : vector<8x128xf32>
    %c0_20 = arith.constant 0 : index
    %c0_21 = arith.constant 0 : index
    %c0_22 = arith.constant 0 : index
    %43 = vector.load %arg6[%c0_20, %c0_21, %c0_22] : memref<4x8x128xf32, #tpu.memory_space<vmem>>, vector<1x8x128xf32>
    %44 = vector.shape_cast %43 : vector<1x8x128xf32> to vector<8x128xf32>
    %45 = vector.shape_cast %36 : vector<8x128xf32> to vector<1x8x128xf32>
    tpu.vector_store %arg6[%c0_20, %c0_21, %c0_22], %45 {strides = array<i32>} : memref<4x8x128xf32, #tpu.memory_space<vmem>>, vector<1x8x128xf32>,
    %c1 = arith.constant 1 : index
    %c0_23 = arith.constant 0 : index
    %c0_24 = arith.constant 0 : index
    %46 = vector.load %arg6[%c1, %c0_23, %c0_24] : memref<4x8x128xf32, #tpu.memory_space<vmem>>, vector<1x8x128xf32>
    %47 = vector.shape_cast %46 : vector<1x8x128xf32> to vector<8x128xf32>
    %48 = vector.shape_cast %42 : vector<8x128xf32> to vector<1x8x128xf32>
    tpu.vector_store %arg6[%c1, %c0_23, %c0_24], %48 {strides = array<i32>} : memref<4x8x128xf32, #tpu.memory_space<vmem>>, vector<1x8x128xf32>,
    %c2 = arith.constant 2 : index
    %c0_25 = arith.constant 0 : index
    %c0_26 = arith.constant 0 : index
    %49 = vector.load %arg6[%c2, %c0_25, %c0_26] : memref<4x8x128xf32, #tpu.memory_space<vmem>>, vector<1x8x128xf32>
    %50 = vector.shape_cast %49 : vector<1x8x128xf32> to vector<8x128xf32>
    %51 = vector.shape_cast %11 : vector<8x128xf32> to vector<1x8x128xf32>
    tpu.vector_store %arg6[%c2, %c0_25, %c0_26], %51 {strides = array<i32>} : memref<4x8x128xf32, #tpu.memory_space<vmem>>, vector<1x8x128xf32>,
    %c3 = arith.constant 3 : index
    %c0_27 = arith.constant 0 : index
    %c0_28 = arith.constant 0 : index
    %52 = vector.load %arg6[%c3, %c0_27, %c0_28] : memref<4x8x128xf32, #tpu.memory_space<vmem>>, vector<1x8x128xf32>
    %53 = vector.shape_cast %52 : vector<1x8x128xf32> to vector<8x128xf32>
    %54 = vector.shape_cast %14 : vector<8x128xf32> to vector<1x8x128xf32>
    tpu.vector_store %arg6[%c3, %c0_27, %c0_28], %54 {strides = array<i32>} : memref<4x8x128xf32, #tpu.memory_space<vmem>>, vector<1x8x128xf32>,
    return
  }
  func.func @transform_0(%arg0: i32) -> (i32, i32) {
    %c0_i32 = arith.constant 0 : i32
    %c0_i32_0 = arith.constant 0 : i32
    return %arg0, %c0_i32 : i32, i32
  }
  func.func @transform_1(%arg0: i32) -> (i32, i32) {
    %c0_i32 = arith.constant 0 : i32
    %c0_i32_0 = arith.constant 0 : i32
    return %arg0, %c0_i32 : i32, i32
  }
  func.func @transform_2(%arg0: i32) -> (i32, i32) {
    %c0_i32 = arith.constant 0 : i32
    %c0_i32_0 = arith.constant 0 : i32
    return %arg0, %c0_i32 : i32, i32
  }
  func.func @transform_3(%arg0: i32) -> (i32, i32) {
    %c0_i32 = arith.constant 0 : i32
    %c0_i32_0 = arith.constant 0 : i32
    return %arg0, %c0_i32 : i32, i32
  }
  func.func @transform_4(%arg0: i32) -> (i32, i32) {
    %c0_i32 = arith.constant 0 : i32
    %c0_i32_0 = arith.constant 0 : i32
    %c0_i32_1 = arith.constant 0 : i32
    return %c0_i32, %c0_i32_0 : i32, i32
  }
  func.func @transform_5(%arg0: i32) -> (i32, i32, i32) {
    %c0_i32 = arith.constant 0 : i32
    %c0_i32_0 = arith.constant 0 : i32
    %c0_i32_1 = arith.constant 0 : i32
    return %c0_i32, %arg0, %c0_i32_0 : i32, i32, i32
  }
}

</mosaic_0001>

<bundles_post_ra>
// kernel: tpu_custom_call.1
= control target key start
LH: loop header
LB: loop body
LE: loop exit
PB: predicated region body
PF: predicated region fallthrough
CT: control target
= control target key end

     0   :  { %10 = vsyncpa [#allocation3], 0  ;;  %s784_s0 = inlined_call_operand.hbm [shape: bf16[8,256], index: 0, kind: input, shape index: {}]   ;;  %s785_s1 = inlined_call_operand.hbm [shape: f32[8,128], index: 1, kind: input, shape index: {}]   ;;  %s786_s2 = inlined_call_operand.hbm [shape: f32[8,128], index: 2, kind: input, shape index: {}]   ;;  %s787_s3 = inlined_call_operand.hbm [shape: f32[8,128], index: 3, kind: input, shape index: {}]   ;;  %s788_s4 = inlined_call_operand.hbm [shape: bf16[256,256], index: 4, kind: input, shape index: {}]   ;;  %s789_s5 = inlined_call_operand.hbm [shape: f32[4,8,128], index: 5, kind: output, shape index: {}]  }
   0x1   :  { %11 = vsyncpa [#allocation6], 0 }
   0x2   :  { %12 = vsyncpa [#allocation9], 0  ;;  %s30_s20 = sshll.u32 %s785_s1, 4  ;;  %s31_s20 = int_to_ptr.hbm [resolvable:$true] %s30_s20 }
   0x3   :  { %13 = vsyncpa [#allocation4], 0  ;;  %s721_s21 = smov [#allocation5]   ;;  %s52_s25 = sshll.u32 %s787_s3, 4  ;;  %s53_s25 = int_to_ptr.hbm [resolvable:$true] %s52_s25 }
   0x4   :  { %s32_s22 = sshll.u32 %s721_s21, 4  ;;  %s722_s26 = smov [#allocation8]   ;;  %s33_s22 = int_to_ptr.vmem [resolvable:$true] %s32_s22 }
   0x5   :  { %35 = dma.hbm_to_vmem [thread:$0]  %s31_s20, 128, %s33_s22, [#allocation6]  }
   0x6   :  { %s54_s27 = sshll.u32 %s722_s26, 4  ;;  %s19_s30 = sshll.u32 %s784_s0, 4  ;;  %s55_s27 = int_to_ptr.vmem [resolvable:$true] %s54_s27  ;;  %s20_s30 = int_to_ptr.hbm [resolvable:$true] %s19_s30 }
   0x7   :  { %57 = dma.hbm_to_vmem [thread:$0]  %s53_s25, 128, %s55_s27, [#allocation9]  }
   0x8   :  { %s41_s7 = sshll.u32 %s786_s2, 4  ;;  %s723_s8 = smov [#allocation2]   ;;  %s42_s7 = int_to_ptr.hbm [resolvable:$true] %s41_s7 }
   0x9   :  { %s21_s9 = sshll.u32 %s723_s8, 4  ;;  %s724_s3 = smov [#allocation7]   ;;  %s22_s9 = int_to_ptr.vmem [resolvable:$true] %s21_s9 }
   0xa   :  { %24 = dma.hbm_to_vmem [thread:$0]  %s20_s30, 128, %s22_s9, [#allocation3]  }
   0xb   :  { %s43_s10 = sshll.u32 %s724_s3, 4  ;;  %s62_s13 = sshll.u32 %s788_s4, 4  ;;  %s44_s10 = int_to_ptr.vmem [resolvable:$true] %s43_s10  ;;  %s63_s13 = int_to_ptr.hbm [resolvable:$true] %s62_s13 }
   0xc   :  { %46 = dma.hbm_to_vmem [thread:$0]  %s42_s7, 128, %s44_s10, [#allocation6]  }
   0xd   :  { %s725_s0 = smov [#allocation10]   ;;  %s726_s15 = smov 128  }
   0xe   :  { %s64_s14 = sshll.u32 %s725_s0, 4  ;;  %s727_s16 = smov 8   ;;  %s65_s14 = int_to_ptr.vmem [resolvable:$true] %s64_s14 }
   0xf   :  { %70 = dma.hbm_to_vmem [thread:$0]  %s63_s13, 4096, %s65_s14, [#allocation9], %s726_s15, %s726_s15, %s727_s16  }
  0x10   :  { %713 = dma.done.wait [#allocation3], 128  }
  0x11   :  { %714 = vsyncadd [#allocation3], 4294967168 }
  0x12   :  { %715 = dma.done.wait [#allocation6], 256  }
  0x13   :  { %716 = vsyncadd [#allocation6], 4294967040 }
  0x14   :  { %717 = dma.done.wait [#allocation9], 4224  }
  0x15   :  { %718 = vsyncadd [#allocation9], 4294963072  ;;  %v456_v0 = vld [vmem:[#allocation10 + $0x70] sm:$0xf]  ;;  %v543_v1 = vld [vmem:[#allocation10 + $0x74] sm:$0xf0] }
  0x16   :  { %v520_v2 = vld [vmem:[#allocation10 + $0xf0] sm:$0xf]  ;;  %v457_v3 = vor.u32 %v543_v1, %v456_v0  ;;  %v559_v4 = vld [vmem:[#allocation10 + $0xf4] sm:$0xf0]  ;;  %v542_v5 = vld [vmem:[#allocation10 + $0x74] sm:$0xf] }
  0x17   :  { %v458_v6 = vld [vmem:[#allocation10 + $0x78] sm:$0xf0]  ;;  %v521_v7 = vor.u32 %v559_v4, %v520_v2  ;;  %v558_v9 = vld [vmem:[#allocation10 + $0xf4] sm:$0xf]  ;;  %v448_v11 = vld [vmem:[#allocation10 + $0x60] sm:$0xf] }
  0x18   :  { %v461_v8 = vor.u32 %v542_v5, %v458_v6  ;;  %v522_v10 = vld [vmem:[#allocation10 + $0xf8] sm:$0xf0]  ;;  %291 = vmatpush.bf16.msra.mxu0 %v457_v3  ;;  %v541_v13 = vld [vmem:[#allocation10 + $0x64] sm:$0xf0]  ;;  %v512_v14 = vld [vmem:[#allocation10 + $0xe0] sm:$0xf] }
  0x19   :  { %v525_v12 = vor.u32 %v558_v9, %v522_v10  ;;  %v557_v15 = vld [vmem:[#allocation10 + $0xe4] sm:$0xf0]  ;;  %304 = vmatpush.bf16.msra.mxu1 %v521_v7  ;;  %v449_v16 = vor.u32 %v541_v13, %v448_v11  ;;  %v540_v18 = vld [vmem:[#allocation10 + $0x64] sm:$0xf]  ;;  %v450_v19 = vld [vmem:[#allocation10 + $0x68] sm:$0xf0] }
  0x1a   :  { %317 = vmatpush.bf16.msra.mxu2 %v461_v8  ;;  %v513_v17 = vor.u32 %v557_v15, %v512_v14  ;;  %v556_v20 = vld [vmem:[#allocation10 + $0xe4] sm:$0xf]  ;;  %v453_v21 = vor.u32 %v540_v18, %v450_v19  ;;  %v514_v22 = vld [vmem:[#allocation10 + $0xe8] sm:$0xf0]  ;;  %v440_v23 = vld [vmem:[#allocation10 + $0x50] sm:$0xf] }
  0x1b   :  { %330 = vmatpush.bf16.msra.mxu3 %v525_v12  ;;  %v539_v24 = vld [vmem:[#allocation10 + $0x54] sm:$0xf0]  ;;  %v517_v25 = vor.u32 %v556_v20, %v514_v22  ;;  %v504_v26 = vld [vmem:[#allocation10 + $0xd0] sm:$0xf]  ;;  %v538_v28 = vld [vmem:[#allocation10 + $0x54] sm:$0xf] }
  0x1c   :  { %v555_v27 = vld [vmem:[#allocation10 + $0xd4] sm:$0xf0]  ;;  %292 = vmatpush.bf16.msra.mxu0 %v449_v16  ;;  %v441_v29 = vor.u32 %v539_v24, %v440_v23  ;;  %v442_v30 = vld [vmem:[#allocation10 + $0x58] sm:$0xf0]  ;;  %v554_v31 = vld [vmem:[#allocation10 + $0xd4] sm:$0xf] }
  0x1d   :  { %v506_v32 = vld [vmem:[#allocation10 + $0xd8] sm:$0xf0]  ;;  %305 = vmatpush.bf16.msra.mxu1 %v513_v17  ;;  %v505_v33 = vor.u32 %v555_v27, %v504_v26  ;;  %v445_v34 = vor.u32 %v538_v28, %v442_v30  ;;  %v432_v35 = vld [vmem:[#allocation10 + $0x40] sm:$0xf]  ;;  %v537_v36 = vld [vmem:[#allocation10 + $0x44] sm:$0xf0] }
  0x1e   :  { %318 = vmatpush.bf16.msra.mxu2 %v453_v21  ;;  %v496_v37 = vld [vmem:[#allocation10 + $0xc0] sm:$0xf]  ;;  %v509_v38 = vor.u32 %v554_v31, %v506_v32  ;;  %v553_v39 = vld [vmem:[#allocation10 + $0xc4] sm:$0xf0]  ;;  %v536_v40 = vld [vmem:[#allocation10 + $0x44] sm:$0xf]  ;;  %v433_v44 = vor.u32 %v537_v36, %v432_v35 }
  0x1f   :  { %331 = vmatpush.bf16.msra.mxu3 %v517_v25  ;;  %v434_v41 = vld [vmem:[#allocation10 + $0x48] sm:$0xf0]  ;;  %v552_v42 = vld [vmem:[#allocation10 + $0xc4] sm:$0xf]  ;;  %v497_v45 = vor.u32 %v553_v39, %v496_v37  ;;  %v424_v47 = vld [vmem:[#allocation10 + $0x30] sm:$0xf] }
  0x20   :  { %v498_v43 = vld [vmem:[#allocation10 + $0xc8] sm:$0xf0]  ;;  %293 = vmatpush.bf16.msra.mxu0 %v441_v29  ;;  %v437_v46 = vor.u32 %v536_v40, %v434_v41  ;;  %v535_v48 = vld [vmem:[#allocation10 + $0x34] sm:$0xf0]  ;;  %v488_v49 = vld [vmem:[#allocation10 + $0xb0] sm:$0xf] }
  0x21   :  { %306 = vmatpush.bf16.msra.mxu1 %v505_v33  ;;  %v501_v50 = vor.u32 %v552_v42, %v498_v43  ;;  %v551_v51 = vld [vmem:[#allocation10 + $0xb4] sm:$0xf0]  ;;  %v534_v52 = vld [vmem:[#allocation10 + $0x34] sm:$0xf]  ;;  %v426_v53 = vld [vmem:[#allocation10 + $0x38] sm:$0xf0]  ;;  %v425_v56 = vor.u32 %v535_v48, %v424_v47 }
  0x22   :  { %319 = vmatpush.bf16.msra.mxu2 %v445_v34  ;;  %v550_v54 = vld [vmem:[#allocation10 + $0xb4] sm:$0xf]  ;;  %v490_v55 = vld [vmem:[#allocation10 + $0xb8] sm:$0xf0]  ;;  %v489_v57 = vor.u32 %v551_v51, %v488_v49  ;;  %v429_v58 = vor.u32 %v534_v52, %v426_v53  ;;  %v416_v59 = vld [vmem:[#allocation10 + $0x20] sm:$0xf] }
  0x23   :  { %332 = vmatpush.bf16.msra.mxu3 %v509_v38  ;;  %v533_v60 = vld [vmem:[#allocation10 + $0x24] sm:$0xf0]  ;;  %v480_v61 = vld [vmem:[#allocation10 + $0xa0] sm:$0xf]  ;;  %v493_v62 = vor.u32 %v550_v54, %v490_v55  ;;  %v532_v0 = vld [vmem:[#allocation10 + $0x24] sm:$0xf] }
  0x24   :  { %294 = vmatpush.bf16.msra.mxu0 %v433_v44  ;;  %v549_v63 = vld [vmem:[#allocation10 + $0xa4] sm:$0xf0]  ;;  %v418_v1 = vld [vmem:[#allocation10 + $0x28] sm:$0xf0]  ;;  %v548_v2 = vld [vmem:[#allocation10 + $0xa4] sm:$0xf]  ;;  %v417_v4 = vor.u32 %v533_v60, %v416_v59 }
  0x25   :  { %307 = vmatpush.bf16.msra.mxu1 %v497_v45  ;;  %v482_v3 = vld [vmem:[#allocation10 + $0xa8] sm:$0xf0]  ;;  %v481_v5 = vor.u32 %v549_v63, %v480_v61  ;;  %v421_v6 = vor.u32 %v532_v0, %v418_v1  ;;  %v408_v7 = vld [vmem:[#allocation10 + $0x10] sm:$0xf]  ;;  %v531_v8 = vld [vmem:[#allocation10 + $0x14] sm:$0xf0] }
  0x26   :  { %320 = vmatpush.bf16.msra.mxu2 %v437_v46  ;;  %v472_v9 = vld [vmem:[#allocation10 + $0x90] sm:$0xf]  ;;  %v485_v10 = vor.u32 %v548_v2, %v482_v3  ;;  %v547_v11 = vld [vmem:[#allocation10 + $0x94] sm:$0xf0]  ;;  %v530_v12 = vld [vmem:[#allocation10 + $0x14] sm:$0xf]  ;;  %v409_v16 = vor.u32 %v531_v8, %v408_v7 }
  0x27   :  { %333 = vmatpush.bf16.msra.mxu3 %v501_v50  ;;  %v410_v13 = vld [vmem:[#allocation10 + $0x18] sm:$0xf0]  ;;  %v546_v14 = vld [vmem:[#allocation10 + $0x94] sm:$0xf]  ;;  %v91_v17 = vld [vmem:[#allocation2] sm:$0xff]  ;;  %v473_v18 = vor.u32 %v547_v11, %v472_v9  ;;  %v728_v3 = vmov 0.0  }
  0x28   :  { %295 = vmatpush.bf16.msra.mxu0 %v425_v56  ;;  %v474_v15 = vld [vmem:[#allocation10 + $0x98] sm:$0xf0]  ;;  %v413_v19 = vor.u32 %v530_v12, %v410_v13  ;;  %v400_v20 = vld [vmem:[#allocation10] sm:$0xf]  ;;  %v529_v21 = vld [vmem:[#allocation10 + $0x4] sm:$0xf0]  ;;  %v125_v29 = vunpack.c.l.b16 %v91_v17  ;;  %v126_v31 = vunpack.c.h.b16 %v91_v17 }
  0x29   :  { %308 = vmatpush.bf16.msra.mxu1 %v489_v57  ;;  %v464_v22 = vld [vmem:[#allocation10 + $0x80] sm:$0xf]  ;;  %v477_v23 = vor.u32 %v546_v14, %v474_v15  ;;  %v545_v24 = vld [vmem:[#allocation10 + $0x84] sm:$0xf0]  ;;  %v528_v25 = vld [vmem:[#allocation10 + $0x4] sm:$0xf]  ;;  %v401_v30 = vor.u32 %v529_v21, %v400_v20 }
  0x2a   :  { %321 = vmatpush.bf16.msra.mxu2 %v429_v58  ;;  %v402_v26 = vld [vmem:[#allocation10 + $0x8] sm:$0xf0]  ;;  %v544_v27 = vld [vmem:[#allocation10 + $0x84] sm:$0xf]  ;;  %v465_v32 = vor.u32 %v545_v24, %v464_v22  ;;  %v127_v35 = vpack.c.b16 %v125_v29, %v125_v29  ;;  %v128_v36 = vpack.c.b16 %v126_v31, %v126_v31  ;;  %v343_v39 = vld [vmem:[#allocation7] sm:$0xff]  ;;  %s729_s2 = smov [#allocation11]  }
  0x2b   :  { %334 = vmatpush.bf16.msra.mxu3 %v493_v62  ;;  %v466_v28 = vld [vmem:[#allocation10 + $0x88] sm:$0xf0]  ;;  %v405_v33 = vor.u32 %v528_v25, %v402_v26  ;;  %v345_v47 = vld [vmem:[#allocation8] sm:$0xff]  ;;  %s381_s4 = sshll.u32 %s729_s2, 4  ;;  %s383_s19 = sshll.u32 %s789_s5, 4  ;;  %s382_s4 = int_to_ptr.vmem [resolvable:$true] %s381_s4  ;;  %s384_s19 = int_to_ptr.hbm [resolvable:$true] %s383_s19 }
  0x2c   :  { %296 = vmatpush.bf16.msra.mxu0 %v417_v4  ;;  %v469_v34 = vor.u32 %v544_v27, %v466_v28  ;;  %v351_v43 = vld [vmem:[#allocation5] sm:$0xff] }
  0x2d   :  { %309 = vmatpush.bf16.msra.mxu1 %v481_v5  ;;  %v352_v49 = vsub.f32 -20.0, %v351_v43  ;;  %v354_v50 = vsub.f32 60.0, %v351_v43  ;;  %v357_v57 = vsub.f32 -100.0, %v351_v43 }
  0x2e   :  { %322 = vmatpush.bf16.msra.mxu2 %v421_v6 }
  0x2f   :  { %335 = vmatpush.bf16.msra.mxu3 %v485_v10  ;;  %v353_v54 = vmul.f32 0.25, %v352_v49 }
  0x30   :  { %297 = vmatpush.bf16.msra.mxu0 %v409_v16 }
  0x31   :  { %310 = vmatpush.bf16.msra.mxu1 %v473_v18 }
  0x32   :  { %323 = vmatpush.bf16.msra.mxu2 %v413_v19 }
  0x33   :  { %336 = vmatpush.bf16.msra.mxu3 %v477_v23 }
  0x34   :  { %298 = vmatpush.bf16.msra.mxu0 %v401_v30 }
  0x35   :  { %311 = vmatpush.bf16.msra.mxu1 %v465_v32 }
  0x36   :  { %324 = vmatpush.bf16.msra.mxu2 %v405_v33 }
  0x37   :  { %337 = vmatpush.bf16.msra.mxu3 %v469_v34  ;;  %299 = vmatmul.bf16.vlgmr.msra.gmra.mxu0 %v127_v35 }
  0x38   :  { %312 = vmatmul.bf16.vlgmr.msra.gmra.mxu1 %v128_v36 }
  0x39   :  { %325 = vmatmul.bf16.vlgmr.msra.gmra.mxu2 %v127_v35 }
  0x3a   :  { %338 = vmatmul.bf16.vlgmr.msra.gmra.mxu3 %v128_v36 }
  0xb4   :  { %v300_v37 = vpop.f32.mrf.mxu0 }
  0xb5   :  { %v313_v38 = vpop.f32.mrf.mxu1 }
  0xb6   :  { %v314_v40 = vadd.f32 %v313_v38, %v300_v37 }
  0xb8   :  { %v344_v41 = vadd.f32 %v343_v39, %v314_v40 }
  0xba   :  { %v347_v42 = vmul.f32 -0.0002, %v344_v41 }
  0xbc   :  { %v326_v44 = vpop.f32.mrf.mxu2  ;;  %v348_v45 = vadd.f32 %v347_v42, %v344_v41  ;;  %v302_v48 = vpop.f32.mrf.mxu0 }
  0xbd   :  { %v339_v46 = vpop.f32.mrf.mxu3  ;;  %v315_v52 = vpop.f32.mrf.mxu1 }
  0xbe   :  { %v340_v51 = vadd.f32 %v339_v46, %v326_v44  ;;  %374 = vst [vmem:[#allocation11 + $0x10] sm:$0xff] %v348_v45  ;;  %v355_v55 = vmul.f32 %v354_v50, %v348_v45 }
  0xc0   :  { %v346_v53 = vadd.f32 %v345_v47, %v340_v51  ;;  %v356_v61 = vadd.f32 %v355_v55, %v353_v54 }
  0xc2   :  { %v349_v56 = vmul.f32 -0.0002, %v346_v53 }
  0xc4   :  { %v350_v58 = vadd.f32 %v349_v56, %v346_v53  ;;  %v328_v59 = vpop.f32.mrf.mxu2 }
  0xc5   :  { %v341_v60 = vpop.f32.mrf.mxu3 }
  0xc6   :  { %v358_v62 = vmul.f32 %v357_v57, %v350_v58  ;;  %376 = vst [vmem:[#allocation11 + $0x18] sm:$0xff] %v350_v58 }
  0xc8   :  { %v359_v63 = vadd.f32 %v358_v62, %v356_v61 }
  0xca   :  { %v360_v0 = vmul.f32 0.005, %v359_v63 }
  0xcc   :  { %v361_v1 = vadd.f32 %v360_v0, %v351_v43 }
  0xce   :  { %v526_v2 = vadd.f32 10.0, %v361_v1 }
  0xd0   :  { %vm363_vm0 = vcmp.gt.f32.partialorder %v526_v2, 0.0 }
  0xd1   :  { %v527_v4 = vsel %vm363_vm0, 1.0, %v728_v3 }
  0xd2   :  { %v366_v5 = vsub.f32 1.0, %v527_v4  ;;  %370 = vst [vmem:[#allocation11] sm:$0xff] %v527_v4  ;;  %v368_v7 = vmul.f32 -70.0, %v527_v4 }
  0xd4   :  { %v367_v6 = vmul.f32 %v366_v5, %v361_v1 }
  0xd6   :  { %v369_v8 = vadd.f32 %v368_v7, %v367_v6 }
  0xd8   :  { %372 = vst [vmem:[#allocation11 + $0x8] sm:$0xff] %v369_v8 }
  0xd9   :  { %389 = dma.vmem_to_hbm [thread:$0]  %s382_s4, 512, %s384_s19, [#allocation4], %s726_s15, %s726_s15, %s727_s16  }
  0xda   :  { %719 = dma.done.wait [#allocation4], 512  }
  0xdb   :  { %720 = vsyncadd [#allocation4], 4294966784 }
  0xdc   :  { %394 = vsyncpa [#allocation3], 1 }
  0xdd   :  { %395 = vsyncpa [#allocation6], 1 }
  0xde   :  { %396 = vsyncpa [#allocation9], 1 }
  0xdf   :  { %397 = vsyncpa [#allocation4], 1 }

</bundles_post_ra>
